<compile_context>
chip_gen: v5e
topology: v5e:2x2
jax: 0.10.0
libtpu: 0.0.40
codegen_flags: <defaults>
</compile_context>

<pallas_src>
import jax
import jax.numpy as jnp
from jax.experimental import pallas as pl
from jax.experimental.pallas import tpu as pltpu


def _normalize_kernel(x_ref, scale_ref, bias_ref, o_ref):
    # Pure elementwise VPU work; the scale/bias broadcast (per-row column or
    # per-lane row) is essentially free.  Math in f32 regardless of input dtype.
    x = x_ref[...].astype(jnp.float32)
    o_ref[...] = (x * scale_ref[...] + bias_ref[...]).astype(o_ref.dtype)


def normalize(x, mean, std, *, target_block_bytes=None, donate_input=False):
    """out = (x - mean[None, :, None, None]) / std[None, :, None, None]  (NCHW)."""
    N, C, H, W = x.shape
    HW = H * W
    itemsize = jnp.dtype(x.dtype).itemsize
    packing = max(1, 4 // itemsize)          # values packed per 32-bit sublane word
    sub = 8 * packing                        # native sublane tile for this dtype

    # Fold the per-channel normalization into a single f32 multiply-add:
    #   out = x * (1/std) + (-mean/std)
    # TODO(synk): for std == 0 this yields NaN where the reference yields +/-inf.
    std32 = jnp.asarray(std, jnp.float32)
    mean32 = jnp.asarray(mean, jnp.float32)
    scale = 1.0 / std32
    bias = -mean32 / std32

    # ---- Chip-gated budgets -------------------------------------------------
    vmem_limit = 32 * 1024 * 1024            # safe on v7x (64 MiB) and v5e
    if target_block_bytes is None:
        target_block_bytes = 4 * 1024 * 1024
        try:
            info = pltpu.get_tpu_info()
            if getattr(info, "vmem_capacity_bytes", 0) >= 128 * 1024 * 1024:
                # v5e / v6e: 128 MiB physical VMEM -> bigger contiguous blocks.
                target_block_bytes = 8 * 1024 * 1024
                vmem_limit = 48 * 1024 * 1024
        except Exception:
            pass
    else:
        vmem_limit = max(vmem_limit, 5 * target_block_bytes)

    # ---- Lane-dense 2D view ---------------------------------------------------
    if HW >= 128:
        # rows = (n, c), lanes = spatial; one scale/bias scalar per row.
        R, L = N * C, HW
        x2 = x.reshape(R, L)
        scale_arr = jnp.tile(scale, N).reshape(R, 1)
        bias_arr = jnp.tile(bias, N).reshape(R, 1)
        scale_along_rows = True
    else:
        # Small spatial maps: widen the lane axis to C*H*W so stores stay
        # lane-dense; scale/bias become a per-lane row broadcast over batch.
        R, L = N, C * HW
        x2 = x.reshape(R, L)
        scale_arr = jnp.repeat(scale, HW).reshape(1, L)
        bias_arr = jnp.repeat(bias, HW).reshape(1, L)
        scale_along_rows = False

    # ---- Tiling ---------------------------------------------------------------
    # Prefer full-width rows (one contiguous HBM DMA per block); fall back to
    # 128-multiple column tiles only when even `sub` full rows blow the budget.
    if sub * L * itemsize <= target_block_bytes or L <= 128:
        col_tile = L
    else:
        col_tile = max(128, (target_block_bytes // (sub * itemsize) // 128) * 128)
    grid_cols = pl.cdiv(L, col_tile)

    # Largest sublane-packed row tile under budget; cap at 1024 so the
    # lane-padded (row_tile, 1) f32 scale/bias blocks stay <= ~2 MiB total.
    row_tile = (target_block_bytes // (col_tile * itemsize) // sub) * sub
    row_tile = int(max(sub, min(row_tile, 1024)))
    if row_tile >= R:
        row_tile = R
    grid_rows = pl.cdiv(R, row_tile)

    # v7x has 2 TensorCores: keep an even number of (parallel) grid steps so
    # both cores stream an equal share of this HBM-bound loop.  Neutral on
    # v5e / v6e (1 TC per chip).
    if (grid_rows * grid_cols) % 2 == 1 and R >= 2 * sub:
        want_rows = grid_rows + 1 if grid_rows > 1 else 2
        row_tile = max(sub, pl.cdiv(pl.cdiv(R, want_rows), sub) * sub)
        grid_rows = pl.cdiv(R, row_tile)

    if scale_along_rows:
        sb_spec = pl.BlockSpec((row_tile, 1), lambda i, j: (i, 0))
    else:
        sb_spec = pl.BlockSpec((1, col_tile), lambda i, j: (0, j))

    cost = pl.CostEstimate(
        flops=2 * R * L,
        transcendentals=0,
        bytes_accessed=2 * R * L * itemsize + 4 * (scale_arr.size + bias_arr.size),
    )

    out2 = pl.pallas_call(
        _normalize_kernel,
        out_shape=jax.ShapeDtypeStruct((R, L), x.dtype),
        grid=(grid_rows, grid_cols),
        in_specs=[
            pl.BlockSpec((row_tile, col_tile), lambda i, j: (i, j)),
            sb_spec,
            sb_spec,
        ],
        out_specs=pl.BlockSpec((row_tile, col_tile), lambda i, j: (i, j)),
        compiler_params=pltpu.CompilerParams(
            dimension_semantics=("parallel", "parallel"),
            vmem_limit_bytes=vmem_limit,
        ),
        cost_estimate=cost,
        input_output_aliases=({0: 0} if donate_input else {}),
    )(x2, scale_arr, bias_arr)

    return out2.reshape(N, C, H, W)


if __name__ == "__main__":
    key = jax.random.PRNGKey(0)

    # The module's forward implies 3 channels (mean/std reshaped to (1,3,1,1)).
    N, C, H, W = 2, 3, 16, 16
    x = jax.random.normal(key, (N, C, H, W), dtype=jnp.float32)

    # Deterministic buffer values (ImageNet-style constants).
    mean = jnp.array([0.485, 0.456, 0.406], dtype=jnp.float32)
    std = jnp.array([0.229, 0.224, 0.225], dtype=jnp.float32)

    out = jax.block_until_ready(normalize(x, mean, std))

    # Reference check (plain JAX, same semantics as the PyTorch forward).
    ref = (x - mean.reshape(1, C, 1, 1)) / std.reshape(1, C, 1, 1)
    assert out.shape == (N, C, H, W)
    assert jnp.allclose(out, ref, atol=1e-5, rtol=1e-5)

    print("KERNEL_OK")
</pallas_src>

<mosaic_0001>
module attributes {stable_mosaic.version = 11 : i64} {
  func.func @_normalize_kernel(%arg0: i32, %arg1: i32, %arg2: memref<6x256xf32, #tpu.memory_space<vmem>>, %arg3: memref<6x1xf32, #tpu.memory_space<vmem>>, %arg4: memref<6x1xf32, #tpu.memory_space<vmem>>, %arg5: memref<6x256xf32, #tpu.memory_space<vmem>>) attributes {dimension_semantics = [#tpu.dimension_semantics<parallel>, #tpu.dimension_semantics<parallel>], iteration_bounds = array<i64: 1, 1>, scalar_prefetch = 0 : i64, scratch_operands = 0 : i64, tpu.core_type = #tpu.core_type<tc>, window_params = [{transform_indices = @transform_0, window_bounds = array<i64: 6, 256>}, {transform_indices = @transform_1, window_bounds = array<i64: 6, 1>}, {transform_indices = @transform_2, window_bounds = array<i64: 6, 1>}, {transform_indices = @transform_3, window_bounds = array<i64: 6, 256>}]} {
    %c0 = arith.constant 0 : index
    %c0_0 = arith.constant 0 : index
    %0 = vector.load %arg2[%c0, %c0_0] : memref<6x256xf32, #tpu.memory_space<vmem>>, vector<6x256xf32>
    %c0_1 = arith.constant 0 : index
    %c0_2 = arith.constant 0 : index
    %1 = vector.load %arg3[%c0_1, %c0_2] : memref<6x1xf32, #tpu.memory_space<vmem>>, vector<6x1xf32>
    %2 = vector.broadcast %1 : vector<6x1xf32> to vector<6x256xf32>
    %3 = arith.mulf %0, %2 : vector<6x256xf32>
    %c0_3 = arith.constant 0 : index
    %c0_4 = arith.constant 0 : index
    %4 = vector.load %arg4[%c0_3, %c0_4] : memref<6x1xf32, #tpu.memory_space<vmem>>, vector<6x1xf32>
    %5 = vector.broadcast %4 : vector<6x1xf32> to vector<6x256xf32>
    %6 = arith.addf %3, %5 : vector<6x256xf32>
    %c0_5 = arith.constant 0 : index
    %c0_6 = arith.constant 0 : index
    %7 = vector.load %arg5[%c0_5, %c0_6] : memref<6x256xf32, #tpu.memory_space<vmem>>, vector<6x256xf32>
    tpu.vector_store %arg5[%c0_5, %c0_6], %6 {strides = array<i32>} : memref<6x256xf32, #tpu.memory_space<vmem>>, vector<6x256xf32>,
    return
  }
  func.func @transform_0(%arg0: i32, %arg1: i32) -> (i32, i32) {
    %c0_i32 = arith.constant 0 : i32
    return %arg0, %arg1 : i32, i32
  }
  func.func @transform_1(%arg0: i32, %arg1: i32) -> (i32, i32) {
    %c0_i32 = arith.constant 0 : i32
    %c0_i32_0 = arith.constant 0 : i32
    return %arg0, %c0_i32 : i32, i32
  }
  func.func @transform_2(%arg0: i32, %arg1: i32) -> (i32, i32) {
    %c0_i32 = arith.constant 0 : i32
    %c0_i32_0 = arith.constant 0 : i32
    return %arg0, %c0_i32 : i32, i32
  }
  func.func @transform_3(%arg0: i32, %arg1: i32) -> (i32, i32) {
    %c0_i32 = arith.constant 0 : i32
    return %arg0, %arg1 : i32, i32
  }
}

</mosaic_0001>

<bundles_post_ra>
// kernel: tpu_custom_call.1
= control target key start
LH: loop header
LB: loop body
LE: loop exit
PB: predicated region body
PF: predicated region fallthrough
CT: control target
= control target key end

     0   :  { %v80_v1 = vmov 0   ;;  %s117_s0 = inlined_call_operand.vmem [shape: f32[6,256], index: 0, kind: input, shape index: {}]   ;;  %s118_s1 = inlined_call_operand.vmem [shape: f32[6,1], index: 1, kind: input, shape index: {}]   ;;  %s119_s2 = inlined_call_operand.vmem [shape: f32[6,1], index: 2, kind: input, shape index: {}]   ;;  %s120_s3 = inlined_call_operand.hbm [shape: f32[6,256], index: 3, kind: output, shape index: {}]  }
   0x1   :  { %v17_v0 = vld [vmem:[%s118_s1] sm:$0x3f]  ;;  %53 = vset.pattern.permute.xlu0 %v80_v1 }
   0x2   :  { %8 = vsyncpa [#allocation3], 0  ;;  %20 = vperm.xlu0 %53, %v17_v0   ;;  %v25_v2 = vld [vmem:[%s119_s2] sm:$0x3f]  ;;  %v16_v5 = vld [vmem:[%s117_s0 + $0x8] sm:$0x3f] }
   0x3   :  { %v15_v4 = vld [vmem:[%s117_s0] sm:$0x3f]  ;;  %s81_s1 = smov [#allocation2]   ;;  %s42_s23 = sshll.u32 %s120_s3, 4  ;;  %s43_s23 = int_to_ptr.hbm [resolvable:$true] %s42_s23 }
   0x4   :  { %s40_s20 = sshll.u32 %s81_s1, 4  ;;  %s41_s20 = int_to_ptr.vmem [resolvable:$true] %s40_s20 }
   0xa   :  { %28 = vperm.xlu0 %53, %v25_v2  }
  0x74   :  { %v21_v3 = vpop.permute.xlu0 %20 }
  0x75   :  { %v23_v6 = vmul.f32 %v21_v3, %v15_v4  ;;  %v24_v7 = vmul.f32 %v21_v3, %v16_v5 }
  0x7c   :  { %v29_v8 = vpop.permute.xlu0 %28 }
  0x7d   :  { %v31_v9 = vadd.f32 %v29_v8, %v23_v6  ;;  %v32_v10 = vadd.f32 %v29_v8, %v24_v7 }
  0x7f   :  { %33 = vst [vmem:[#allocation2] sm:$0x3f] %v31_v9 }
  0x80   :  { %34 = vst [vmem:[#allocation2 + $0x8] sm:$0x3f] %v32_v10 }
  0x81   :  { %45 = dma.vmem_to_hbm [thread:$0]  %s41_s20, 256, %s43_s23, [#allocation3]  }
  0x82   :  { %78 = dma.done.wait [#allocation3], 256  }
  0x83   :  { %79 = vsyncadd [#allocation3], 4294967040 }
  0x84   :  { %50 = vsyncpa [#allocation3], 1 }

</bundles_post_ra>
